<compile_context>
chip_gen: v7x
topology: tpu7x:2x2x1
jax: 0.10.0
libtpu: 0.0.40
codegen_flags: <defaults>
</compile_context>

<pallas_src>
import functools

import jax
import jax.numpy as jnp
from jax.experimental import pallas as pl
from jax.experimental.pallas import tpu as pltpu

LANE = 128
SUBLANE = 8


def _round_up(x, m):
    return ((x + m - 1) // m) * m


@functools.lru_cache(maxsize=1)
def _hw_params():
    """Generation-aware block / VMEM sizing (v5e/v6e: 128 MiB VMEM, v7x: 64 MiB/TC)."""
    try:
        vmem_cap = int(pltpu.get_tpu_info().vmem_capacity_bytes)
    except Exception:
        vmem_cap = 64 * 1024 * 1024                   # conservative (v7x per-TC)
    # In + out, each double buffered => ~4x block resident in VMEM.
    block_bytes = min(8 * 1024 * 1024, vmem_cap // 8)
    vmem_limit = min(vmem_cap * 3 // 4, 64 * 1024 * 1024)  # 48 MiB on v7x, 64 MiB else
    return block_bytes, vmem_limit


# ---------------------------------------------------------------------------
# Pallas kernel (backward hot path): grad -> -lambda * grad
# ---------------------------------------------------------------------------
def _neg_scale_kernel(lmbda_ref, g_ref, o_ref):
    # SMEM f32 scalar read (scalar slot, free). Multiply in f32, single cast on
    # store => exact to output precision even for bf16 grads (mem-bound, so the
    # extra cast is free on the VPU).
    scale = -lmbda_ref[0]
    o_ref[...] = (scale * g_ref[...].astype(jnp.float32)).astype(o_ref.dtype)


def _plan(n, itemsize, block_bytes):
    """Pick a lane-dense (rows, cols) view + row tile for a flat length-n array.

    Returns None for ragged n (not a multiple of 128): those take the fused
    plain-JAX path instead of paying pad + slice HBM round-trips.
    """
    if n == 0 or n % LANE != 0:
        return None
    cols = None
    for c in (4096, 2048, 1024, 512, 256, LANE):      # prefer wide, but keep enough rows
        if n % c == 0 and n // c >= 4 * SUBLANE:
            cols = c
            break
    if cols is None:
        for c in (4096, 2048, 1024, 512, 256, LANE):
            if n % c == 0:
                cols = c
                break
    rows = n // cols
    if rows <= SUBLANE:
        return rows, cols, rows, 1                    # tiny tensor: single full-extent block

    tile_rows = max(SUBLANE, (block_bytes // (cols * itemsize)) // SUBLANE * SUBLANE)
    # Never collapse to grid=(1,): keep >=4 pipelined steps (>=2 per TC on v7x).
    tile_rows = min(tile_rows, max(SUBLANE, _round_up(pl.cdiv(rows, 4), SUBLANE)))
    steps = pl.cdiv(rows, tile_rows)
    # Prefer an even step count so v7x's 2 TensorCores split the work evenly.
    if steps > 1 and steps % 2 == 1:
        alt = max(SUBLANE, _round_up(pl.cdiv(rows, steps + 1), SUBLANE))
        if pl.cdiv(rows, alt) % 2 == 0:
            tile_rows, steps = alt, pl.cdiv(rows, alt)
    return rows, cols, tile_rows, steps


def _neg_scale_pallas(g, lmbda):
    """dx = -lambda * g.  Pallas kernel for lane-aligned sizes, fused JAX otherwise."""
    shape, dtype = g.shape, g.dtype
    itemsize = jnp.dtype(dtype).itemsize
    n = g.size
    block_bytes, vmem_limit = _hw_params()
    plan = _plan(n, itemsize, block_bytes)
    if plan is None:
        # Ragged / empty: plain JAX. XLA fuses the scale into g's producer, which
        # is strictly cheaper than padding + slicing around a dedicated kernel.
        return (-jnp.asarray(lmbda, jnp.float32) * g.astype(jnp.float32)).astype(dtype)

    rows, cols, tile_rows, steps = plan
    g2d = g.reshape(rows, cols)                        # row-major flatten: free
    lmbda_arr = jnp.asarray(lmbda, jnp.float32).reshape(1)

    block = pl.BlockSpec((tile_rows, cols), lambda i: (i, 0))
    out2d = pl.pallas_call(
        _neg_scale_kernel,
        out_shape=jax.ShapeDtypeStruct((rows, cols), dtype),
        grid_spec=pltpu.PrefetchScalarGridSpec(
            num_scalar_prefetch=0,
            grid=(steps,),
            in_specs=[
                pl.BlockSpec(memory_space=pltpu.MemorySpace.SMEM),  # lambda scalar
                block,                                              # grad slab
            ],
            out_specs=block,
        ),
        input_output_aliases={1: 0},          # rescale grad in place (no extra HBM buffer)
        compiler_params=pltpu.CompilerParams(
            # "parallel" lets v7x shard the grid across its 2 TCs; CORE_PARALLEL is an
            # alternative if a toolchain does not auto-split on plain parallel.
            dimension_semantics=("parallel",),
            vmem_limit_bytes=vmem_limit,      # above v5e's 16 MiB scoped default
        ),
        cost_estimate=pl.CostEstimate(
            flops=n, transcendentals=0, bytes_accessed=2 * n * itemsize),
    )(lmbda_arr, g2d)
    return out2d.reshape(shape)


# ---------------------------------------------------------------------------
# custom_vjp wiring: forward is identity (view_as), backward flips & scales
# ---------------------------------------------------------------------------
@jax.custom_vjp
def _grl_pallas(x, lmbda):
    return x                                  # identity: no kernel, no HBM traffic


def _grl_pallas_fwd(x, lmbda):
    return x, lmbda                           # residual = runtime lambda (traced value)


def _grl_pallas_bwd(lmbda, g):
    return _neg_scale_pallas(g, lmbda), jnp.zeros_like(lmbda)


_grl_pallas.defvjp(_grl_pallas_fwd, _grl_pallas_bwd)


@jax.custom_vjp
def _grl_fused(x, lmbda):
    return x


def _grl_fused_fwd(x, lmbda):
    return x, lmbda


def _grl_fused_bwd(lmbda, g):
    dx = (-jnp.asarray(lmbda, jnp.float32) * g.astype(jnp.float32)).astype(g.dtype)
    return dx, jnp.zeros_like(lmbda)


_grl_fused.defvjp(_grl_fused_fwd, _grl_fused_bwd)


def gradient_reversal(x, lmbda, use_pallas=True):
    """Identity forward; backward = -lambda * grad (Pallas or fully fused JAX)."""
    return _grl_pallas(x, lmbda) if use_pallas else _grl_fused(x, lmbda)


class GradientReversalLayer:
    """JAX/Pallas equivalent of the PyTorch GradientReversalLayer."""

    def __init__(self, lmbda, use_pallas=True):
        # Runtime scalar: annealing lambda every step never recompiles the kernel.
        self.lmbda = jnp.asarray(lmbda, dtype=jnp.float32)
        self.use_pallas = use_pallas

    def __call__(self, x):
        return gradient_reversal(x, self.lmbda, use_pallas=self.use_pallas)


# ---------------------------------------------------------------------------
# Demo / self-test
# ---------------------------------------------------------------------------
if __name__ == "__main__":
    key = jax.random.PRNGKey(0)
    # NCHW input, small shapes: batch=2, channels=4, spatial=16x16
    x = jax.random.normal(key, (2, 4, 16, 16), dtype=jnp.float32)

    lmbda = 0.5
    layer = GradientReversalLayer(lmbda)

    # Forward: identity (no copy kernel, matches view_as(x) semantics).
    y = jax.block_until_ready(layer(x))
    assert y.shape == x.shape and y.dtype == x.dtype
    assert bool(jnp.allclose(y, x)), "forward must be identity"

    # Backward: d/dx sum(layer(x)) == -lambda everywhere.
    grad = jax.block_until_ready(jax.grad(lambda inp: jnp.sum(layer(inp)))(x))
    assert bool(jnp.allclose(grad, -lmbda * jnp.ones_like(x))), \
        "backward must scale grads by -lambda"

    # Larger lane-aligned shape exercises the multi-step pipelined grid.
    x_big = jax.random.normal(key, (2, 16, 32, 32), dtype=jnp.float32)
    grad_big = jax.block_until_ready(
        jax.grad(lambda inp: jnp.sum(layer(inp)))(x_big))
    assert bool(jnp.allclose(grad_big, -lmbda * jnp.ones_like(x_big))), \
        "backward must be correct on multi-block grids"

    # bf16 grads: multiply happens in f32, cast once on store.
    x_bf16 = x.astype(jnp.bfloat16)
    grad_bf16 = jax.block_until_ready(
        jax.grad(lambda inp: jnp.sum(layer(inp).astype(jnp.float32)))(x_bf16))
    assert grad_bf16.dtype == jnp.bfloat16
    assert bool(jnp.allclose(grad_bf16.astype(jnp.float32), -lmbda)), \
        "backward must handle bf16 grads exactly"

    # Ragged shape (size not a multiple of 128) takes the fused fallback (no pad/slice).
    x_odd = jax.random.normal(key, (2, 3, 5, 7), dtype=jnp.float32)
    grad_odd = jax.block_until_ready(
        jax.grad(lambda inp: jnp.sum(layer(inp)))(x_odd))
    assert bool(jnp.allclose(grad_odd, -lmbda * jnp.ones_like(x_odd))), \
        "backward must handle ragged shapes"

    # Different lambda at runtime: no kernel rebuild, still correct.
    layer2 = GradientReversalLayer(1.25)
    grad2 = jax.block_until_ready(
        jax.grad(lambda inp: jnp.sum(layer2(inp)))(x))
    assert bool(jnp.allclose(grad2, -1.25 * jnp.ones_like(x))), \
        "backward must track runtime lambda"

    # Fully fused (non-Pallas) option.
    layer3 = GradientReversalLayer(0.75, use_pallas=False)
    grad3 = jax.block_until_ready(
        jax.grad(lambda inp: jnp.sum(layer3(inp)))(x))
    assert bool(jnp.allclose(grad3, -0.75 * jnp.ones_like(x))), \
        "fused backward must match"

    print("KERNEL_OK")
</pallas_src>

<mosaic_0001>
module attributes {stable_mosaic.version = 11 : i64} {
  func.func @_neg_scale_kernel(%arg0: i32, %arg1: memref<1xf32, #tpu.memory_space<smem>>, %arg2: memref<1x2048xf32, #tpu.memory_space<vmem>>, %arg3: memref<1x2048xf32, #tpu.memory_space<vmem>>) attributes {dimension_semantics = [#tpu.dimension_semantics<parallel>], iteration_bounds = array<i64: 1>, scalar_prefetch = 0 : i64, scratch_operands = 0 : i64, tpu.core_type = #tpu.core_type<tc>, window_params = [{transform_indices = @transform_0, window_bounds = array<i64: 1>}, {transform_indices = @transform_1, window_bounds = array<i64: 1, 2048>}, {transform_indices = @transform_2, window_bounds = array<i64: 1, 2048>}]} {
    %c0 = arith.constant 0 : index
    %0 = memref.load %arg1[%c0] : memref<1xf32, #tpu.memory_space<smem>>
    %cst = arith.constant 0.000000e+00 : f32
    %1 = arith.subf %cst, %0 : f32
    %c0_0 = arith.constant 0 : index
    %c0_1 = arith.constant 0 : index
    %2 = vector.load %arg2[%c0_0, %c0_1] : memref<1x2048xf32, #tpu.memory_space<vmem>>, vector<1x2048xf32>
    %3 = vector.broadcast %1 : f32 to vector<1x2048xf32>
    %4 = arith.mulf %3, %2 : vector<1x2048xf32>
    %c0_2 = arith.constant 0 : index
    %c0_3 = arith.constant 0 : index
    %5 = vector.load %arg3[%c0_2, %c0_3] : memref<1x2048xf32, #tpu.memory_space<vmem>>, vector<1x2048xf32>
    tpu.vector_store %arg3[%c0_2, %c0_3], %4 {strides = array<i32>} : memref<1x2048xf32, #tpu.memory_space<vmem>>, vector<1x2048xf32>,
    return
  }
  func.func @transform_0(%arg0: i32) -> i32 {
    %c0_i32 = arith.constant 0 : i32
    %c0_i32_0 = arith.constant 0 : i32
    return %c0_i32 : i32
  }
  func.func @transform_1(%arg0: i32) -> (i32, i32) {
    %c0_i32 = arith.constant 0 : i32
    %c0_i32_0 = arith.constant 0 : i32
    return %arg0, %c0_i32 : i32, i32
  }
  func.func @transform_2(%arg0: i32) -> (i32, i32) {
    %c0_i32 = arith.constant 0 : i32
    %c0_i32_0 = arith.constant 0 : i32
    return %arg0, %c0_i32 : i32, i32
  }
}

</mosaic_0001>

<bundles_post_ra>
// kernel: tpu_custom_call.1
= control target key start
LH: loop header
LB: loop body
LE: loop exit
PB: predicated region body
PF: predicated region fallthrough
CT: control target
= control target key end

     0   :  { %8 = vsyncpa [#allocation4], 0  ;;  %s143_s0 = inlined_call_operand.<no memory space> [shape: f32[1], index: 0, kind: input, shape index: {}]   ;;  %s144_s1 = inlined_call_operand.hbm [shape: f32[1,2048], index: 1, kind: input, shape index: {}, may-alias: {1,2}]   ;;  %s145_s2 = inlined_call_operand.hbm [shape: f32[1,2048], index: 2, kind: output, shape index: {}, may-alias: {1,2}]  }
   0x1   :  { %9 = vsyncpa [#allocation5], 0  ;;  %s99_s9 = smov [#allocation3]   ;;  %s51_s13 = scalar_lea.hbm %s144_s1, 256 }
   0x2   :  { %s18_s10 = sshll.u32 %s99_s9, 4  ;;  %p52_p0 = scmp.ne.s32.totalorder %s144_s1, %s51_s13  ;;  %s19_s10 = int_to_ptr.vmem [resolvable:$true] %s18_s10 }
   0x3   :  { %p55_p1 = scmp.lt.u32.totalorder %s51_s13, %s144_s1 }
   0x5   :  { %p57_p2 = pnand %p55_p1, %p52_p0 }
   0x7   :  { %60 = shalt.err (!%p57_p2)
}
   0x8   :  { %s61_s18 = scalar_lea.vmem %s19_s10, 256  ;;  %p66_p4 = scmp.lt.s32.totalorder %s19_s10, %s19_s10 }
   0x9   :  { %p62_p3 = scmp.ne.s32.totalorder %s19_s10, %s61_s18  ;;  %p67_p5 = scmp.lt.s32.totalorder %s61_s18, %s61_s18 }
   0xb   :  { %p68_p6 = por %p67_p5, %p66_p4 }
   0xd   :  { %p69_p7 = pnand %p68_p6, %p62_p3 }
   0xf   :  { %72 = shalt.err (!%p69_p7)
}
  0x10   :  { %21 = dma.hbm_to_vmem [thread:$0]  %s144_s1, 256, %s19_s10, [#allocation4]  }
  0x11   :  { %95 = dma.done.wait [#allocation4], 256  }
  0x12   :  { %96 = vsyncadd [#allocation4], 4294967040  ;;  %s26_s23 = ssub.f32 0.0, %s143_s0  ;;  %s100_s24 = smov [#allocation6]   ;;  %v27_v1 = vld [vmem:[#allocation3] sm:$0xff]  ;;  %v28_v2 = vld [vmem:[#allocation3 + $0x8] sm:$0xff] }
  0x13   :  { %s40_s25 = sshll.u32 %s100_s24, 4  ;;  %s41_s25 = int_to_ptr.vmem [resolvable:$true] %s40_s25 }
  0x14   :  { %v29_v0 = vstv %s26_s23  ;;  %s73_s26 = scalar_lea.vmem %s41_s25, 256  ;;  %p78_p9 = scmp.lt.s32.totalorder %s41_s25, %s41_s25 }
  0x15   :  { %v30_v3 = vmul.f32 %v29_v0, %v27_v1  ;;  %v31_v4 = vmul.f32 %v29_v0, %v28_v2  ;;  %p74_p8 = scmp.ne.s32.totalorder %s41_s25, %s73_s26  ;;  %p79_p10 = scmp.lt.s32.totalorder %s73_s26, %s73_s26 }
  0x17   :  { %32 = vst [vmem:[#allocation6] sm:$0xff] %v30_v3  ;;  %33 = vst [vmem:[#allocation6 + $0x8] sm:$0xff] %v31_v4  ;;  %p80_p11 = por %p79_p10, %p78_p9 }
  0x19   :  { %p81_p12 = pnand %p80_p11, %p74_p8 }
  0x1b   :  { %84 = shalt.err (!%p81_p12)
}
  0x1c   :  { %s85_s0 = scalar_lea.hbm %s145_s2, 256 }
  0x1d   :  { %p86_p13 = scmp.ne.s32.totalorder %s145_s2, %s85_s0  ;;  %p89_p0 = scmp.lt.u32.totalorder %s85_s0, %s145_s2 }
  0x1f   :  { %p91_p1 = pnand %p89_p0, %p86_p13 }
  0x21   :  { %94 = shalt.err (!%p91_p1)
}
  0x22   :  { %43 = dma.vmem_to_hbm [thread:$0]  %s41_s25, 256, %s145_s2, [#allocation5]  }
  0x23   :  { %97 = dma.done.wait [#allocation5], 256  }
  0x24   :  { %98 = vsyncadd [#allocation5], 4294967040 }
  0x25   :  { %47 = vsyncpa [#allocation4], 1 }
  0x26   :  { %48 = vsyncpa [#allocation5], 1 }

</bundles_post_ra>
